<compile_context>
chip_gen: v6e
topology: v6e:2x2x1
jax: 0.10.0
libtpu: 0.0.40
codegen_flags: <defaults>
</compile_context>

<pallas_src>
import math

import numpy as np
import jax
import jax.numpy as jnp
from jax.experimental import pallas as pl
from jax.experimental.pallas import tpu as pltpu

# ---- problem sizes (small, consistent with the module) ----
B = 2          # batch size
S = 8          # seq_len
D_IN = 32      # input_dim
H = 32         # hidden_dim (slot_linear_in / attention hidden)
NI = 8         # num_intent
L = 16         # num_slot_labels

_INV_SQRT_H = 1.0 / math.sqrt(H)
_NEG_BIG = 1e30   # finite "minus infinity" used as an additive mask bias

# ---- packed weight-slab layout: one (SLAB_ROWS, 2H) f32 array, sublane-aligned rows ----
H2 = 2 * H
R_WQ = 0                 # rows [ 0,32): [w_in | w_in @ w_p_q]          (D_IN, 2H)
R_WV = R_WQ + D_IN       # rows [32,40): [w_v  | w_v  @ w_p_a]          (NI,   2H)
R_WOUT = R_WV + NI       # rows [40,72): w_out in lanes [0, L)          (H,    2H)
R_BQ = R_WOUT + H        # row   72:     [b_in | b_in @ w_p_q + b_p]    (1,    2H)
R_BOUT = R_BQ + 1        # row   73:     b_out in lanes [0, L)          (1,    2H)
SLAB_ROWS = ((R_BOUT + 1 + 7) // 8) * 8   # pad to a sublane multiple -> 80


def slot_classifier_kernel(
    x_ref,       # (B*S, D_IN)      tokens flattened over batch*seq
    intent_ref,  # (B, NI)          intent logits
    mask_ref,    # (B, S, 1)        float32, 1.0 = valid token, 0.0 = padding
    w_ref,       # (SLAB_ROWS, 2H)  packed weights/biases (see layout above)
    o_ref,       # (B*S, L)
):
    x = x_ref[...]                                                                   # (BS, D)

    # (1) fused query-side GEMM: ONE (16,32)@(32,64) matmul -> [q | qp]
    qqp = (
        jnp.dot(x, w_ref[R_WQ:R_WQ + D_IN, :], preferred_element_type=jnp.float32)
        + w_ref[R_BQ:R_BQ + 1, :]
    )                                                                                # (BS, 2H)
    q3 = qqp[:, :H].reshape(B, S, H)     # queries (attention scores only)
    qp3 = qqp[:, H:].reshape(B, S, H)    # pre-folded proj "queries" branch

    # ---- intent softmax over the intent axis (lane reduce); reciprocal on the EUP ----
    logits = intent_ref[...]                                                         # (B, NI)
    lexp = jnp.exp(logits - jnp.max(logits, axis=-1, keepdims=True))
    probs = lexp * pl.reciprocal(jnp.sum(lexp, axis=-1, keepdims=True), approx=True)

    # (2) fused value GEMM: (2,8)@(8,64) -> [v | va], no serial v -> va dependency
    vva = jnp.dot(probs, w_ref[R_WV:R_WV + NI, :], preferred_element_type=jnp.float32)
    v3 = vva[:, :H].reshape(B, 1, H)                                                 # values
    va3 = vva[:, H:].reshape(B, 1, H)                                                # v @ W_p_a

    # ---- attention scores: VPU multiply + lane reduce (no degenerate (S,1) MXU matmul) ----
    scores = jnp.sum(q3 * v3, axis=-1, keepdims=True) * _INV_SQRT_H                  # (B, S, 1)
    # masking as a finite additive bias (mask==0 -> -1e30); softmax over the sequence axis
    scores = scores + (mask_ref[...] - 1.0) * _NEG_BIG
    sexp = jnp.exp(scores - jnp.max(scores, axis=1, keepdims=True))
    att_w = sexp * pl.reciprocal(jnp.sum(sexp, axis=1, keepdims=True), approx=True)  # (B, S, 1)

    # ---- proj(concat([q, att_out])) with rank-1 att_out: relu(qp + att_w (x) va) ----
    h = jnp.maximum(qp3 + att_w * va3, 0.0).reshape(B * S, H)                        # (BS, H)

    # ---- slot_linear_out (dropout rate 0.0 -> identity) ----
    o_ref[...] = (
        jnp.dot(h, w_ref[R_WOUT:R_WOUT + H, :L], preferred_element_type=jnp.float32)
        + w_ref[R_BOUT:R_BOUT + 1, :L]
    )


def pack_params(params):
    """ONE-TIME fold + pack of all weights into a single (SLAB_ROWS, 2H) slab.

    Hoisted out of the per-call path (was previously inside the jitted wrapper):
      * proj "queries" branch folded through slot_linear_in:
          (x @ W_in + b_in) @ W_p_q + b_p == x @ (W_in @ W_p_q) + (b_in @ W_p_q + b_p)
      * proj "att_output" branch folded through value_mlp_in:  w_v @ W_p_a
    All Linear weights are expected PRE-TRANSPOSED as (in, out): y = x @ W + b.
    """
    (w_in, b_in, w_v, w_p_q, w_p_a, b_p, w_out, b_out) = params
    hp = jax.lax.Precision.HIGHEST
    w_qp = jnp.dot(w_in, w_p_q, precision=hp)           # (D_IN, H)
    b_qp = jnp.dot(b_in, w_p_q, precision=hp) + b_p     # (1, H)
    w_vpa = jnp.dot(w_v, w_p_a, precision=hp)           # (NI, H)

    slab = jnp.zeros((SLAB_ROWS, H2), jnp.float32)
    slab = slab.at[R_WQ:R_WQ + D_IN, :H].set(w_in)
    slab = slab.at[R_WQ:R_WQ + D_IN, H:].set(w_qp)
    slab = slab.at[R_WV:R_WV + NI, :H].set(w_v)
    slab = slab.at[R_WV:R_WV + NI, H:].set(w_vpa)
    slab = slab.at[R_WOUT:R_WOUT + H, :L].set(w_out)
    slab = slab.at[R_BQ, :H].set(b_in[0])
    slab = slab.at[R_BQ, H:].set(b_qp[0])
    slab = slab.at[R_BOUT, :L].set(b_out[0])
    return slab


@jax.jit
def slot_classifier(x, intent_context, mask, w_slab):
    """x: (B,S,D_IN), intent_context: (B,NI), mask: (B,S) 1=valid/0=pad, w_slab: pack_params().
    Returns (B,S,L)."""
    x2 = x.reshape(B * S, D_IN)
    mask3 = mask.reshape(B, S, 1).astype(jnp.float32)

    vmem = pl.BlockSpec(memory_space=pltpu.MemorySpace.VMEM)
    out = pl.pallas_call(
        slot_classifier_kernel,
        out_shape=jax.ShapeDtypeStruct((B * S, L), jnp.float32),
        # Single invocation, no grid: total footprint is ~30 KiB (far below VMEM on any gen)
        # and per-grid-step overhead (~0.35 us) would dominate a (B,) grid.  See module
        # docstring for the v7x two-TensorCore / production-size scaling plan.
        in_specs=[vmem] * 4,
        out_specs=vmem,
    )(x2, intent_context, mask3, w_slab)
    return out.reshape(B, S, L)


def reference_forward(x, intent_context, mask, params):
    """Pure-JAX reference of the PyTorch forward (use_attention=True), HIGHEST precision."""
    (w_in, b_in, w_v, w_p_q, w_p_a, b_p, w_out, b_out) = params
    hp = jax.lax.Precision.HIGHEST
    q = jnp.einsum("bsd,dh->bsh", x, w_in, precision=hp) + b_in                 # slot_linear_in
    probs = jax.nn.softmax(intent_context, axis=1)[:, None, :]                  # (B, 1, NI)
    v = jnp.einsum("bon,nh->boh", probs, w_v, precision=hp)                     # value_mlp_in
    scores = jnp.einsum("bsh,boh->bso", q, v, precision=hp) / np.sqrt(H)        # (B, S, 1)
    scores = jnp.where(mask[:, :, None] == 0, -jnp.inf, scores)
    att_w = jax.nn.softmax(scores, axis=1)                                      # softmax over seq
    att_out = jnp.einsum("bso,boh->bsh", att_w, v, precision=hp)                # (B, S, H)
    h = jax.nn.relu(
        jnp.einsum("bsh,hk->bsk", q, w_p_q, precision=hp)
        + jnp.einsum("bsh,hk->bsk", att_out, w_p_a, precision=hp)
        + b_p
    )
    return jnp.einsum("bsh,hl->bsl", h, w_out, precision=hp) + b_out


if __name__ == "__main__":
    key = jax.random.PRNGKey(0)
    ks = jax.random.split(key, 10)

    # deterministic synthetic parameters (already transposed to (in, out))
    scale = 0.1
    w_in = scale * jax.random.normal(ks[0], (D_IN, H), jnp.float32)
    b_in = scale * jax.random.normal(ks[1], (1, H), jnp.float32)
    w_v = scale * jax.random.normal(ks[2], (NI, H), jnp.float32)
    w_p_q = scale * jax.random.normal(ks[3], (H, H), jnp.float32)   # proj rows for queries
    w_p_a = scale * jax.random.normal(ks[4], (H, H), jnp.float32)   # proj rows for att_output
    b_p = scale * jax.random.normal(ks[5], (1, H), jnp.float32)
    w_out = scale * jax.random.normal(ks[6], (H, L), jnp.float32)
    b_out = scale * jax.random.normal(ks[7], (1, L), jnp.float32)
    params = (w_in, b_in, w_v, w_p_q, w_p_a, b_p, w_out, b_out)

    # one-time weight fold + pack (outside the per-call hot path)
    w_slab = jax.block_until_ready(pack_params(params))

    # inputs
    x = jax.random.normal(ks[8], (B, S, D_IN), jnp.float32)
    intent_context = jax.random.normal(ks[9], (B, NI), jnp.float32)
    # mask: 1 = valid token, 0 = padding (>= 1 valid token per row, as in the module's usage)
    mask = jnp.array(
        [[1, 1, 1, 1, 1, 0, 0, 0],
         [1, 1, 1, 1, 1, 1, 1, 0]], dtype=jnp.float32
    )

    out = jax.block_until_ready(slot_classifier(x, intent_context, mask, w_slab))
    ref = reference_forward(x, intent_context, mask, params)

    # Tolerance note: the kernel's MXU matmuls run at the TPU default (bf16-pass) precision and
    # the algebraic refactorings (weight folds, rank-1 attention) re-associate sums, while the
    # reference uses Precision.HIGHEST; the approx-reciprocal softmax denominators add only
    # ~2^-12 relative error on top.  ~1e-3-level absolute differences are expected and benign.
    np.testing.assert_allclose(np.asarray(out), np.asarray(ref), rtol=2e-3, atol=2e-3)

    print("KERNEL_OK")
</pallas_src>

<mosaic_0001>
module attributes {stable_mosaic.version = 11 : i64} {
  func.func @slot_classifier_kernel(%arg0: memref<16x32xf32, #tpu.memory_space<vmem>>, %arg1: memref<2x8xf32, #tpu.memory_space<vmem>>, %arg2: memref<2x8x1xf32, #tpu.memory_space<vmem>>, %arg3: memref<80x64xf32, #tpu.memory_space<vmem>>, %arg4: memref<16x16xf32, #tpu.memory_space<vmem>>) attributes {dimension_semantics = [], scalar_prefetch = 0 : i64, scratch_operands = 0 : i64, tpu.core_type = #tpu.core_type<tc>} {
    %c0 = arith.constant 0 : index
    %c0_0 = arith.constant 0 : index
    %0 = vector.load %arg0[%c0, %c0_0] : memref<16x32xf32, #tpu.memory_space<vmem>>, vector<16x32xf32>
    %c0_1 = arith.constant 0 : index
    %c0_2 = arith.constant 0 : index
    %1 = vector.load %arg3[%c0_1, %c0_2] : memref<80x64xf32, #tpu.memory_space<vmem>>, vector<32x64xf32>
    %cst = arith.constant dense<0.000000e+00> : vector<16x64xf32>
    %2 = tpu.matmul %0, %1, %cst {dimension_numbers = #tpu.dot_dimension_numbers<[1], [0], [0], [1], [0, 0, 1, 1], [], []>} : vector<16x32xf32>, vector<32x64xf32>, vector<16x64xf32> -> vector<16x64xf32>
    %c72 = arith.constant 72 : index
    %c0_3 = arith.constant 0 : index
    %3 = vector.load %arg3[%c72, %c0_3] : memref<80x64xf32, #tpu.memory_space<vmem>>, vector<1x64xf32>
    %4 = vector.broadcast %3 : vector<1x64xf32> to vector<16x64xf32>
    %5 = arith.addf %2, %4 : vector<16x64xf32>
    %6 = vector.extract_strided_slice %5 {offsets = [0, 0], sizes = [16, 32], strides = [1, 1]} : vector<16x64xf32> to vector<16x32xf32>
    %7 = vector.shape_cast %6 : vector<16x32xf32> to vector<2x8x32xf32>
    %8 = vector.extract_strided_slice %5 {offsets = [0, 32], sizes = [16, 32], strides = [1, 1]} : vector<16x64xf32> to vector<16x32xf32>
    %9 = vector.shape_cast %8 : vector<16x32xf32> to vector<2x8x32xf32>
    %c0_4 = arith.constant 0 : index
    %c0_5 = arith.constant 0 : index
    %10 = vector.load %arg1[%c0_4, %c0_5] : memref<2x8xf32, #tpu.memory_space<vmem>>, vector<2x8xf32>
    %cst_6 = arith.constant dense<0xFF800000> : vector<2xf32>
    %11 = vector.multi_reduction <maximumf>, %10, %cst_6 [1] : vector<2x8xf32> to vector<2xf32>
    %12 = vector.shape_cast %11 : vector<2xf32> to vector<2x1xf32>
    %13 = vector.broadcast %12 : vector<2x1xf32> to vector<2x8xf32>
    %14 = arith.subf %10, %13 : vector<2x8xf32>
    %15 = math.exp %14 : vector<2x8xf32>
    %cst_7 = arith.constant dense<0.000000e+00> : vector<2xf32>
    %16 = vector.multi_reduction <add>, %15, %cst_7 [1] : vector<2x8xf32> to vector<2xf32>
    %17 = vector.shape_cast %16 : vector<2xf32> to vector<2x1xf32>
    %18 = tpu.reciprocal %17 {approx = true} : vector<2x1xf32> -> vector<2x1xf32>
    %19 = vector.broadcast %18 : vector<2x1xf32> to vector<2x8xf32>
    %20 = arith.mulf %15, %19 : vector<2x8xf32>
    %c32 = arith.constant 32 : index
    %c0_8 = arith.constant 0 : index
    %21 = vector.load %arg3[%c32, %c0_8] : memref<80x64xf32, #tpu.memory_space<vmem>>, vector<8x64xf32>
    %cst_9 = arith.constant dense<0.000000e+00> : vector<2x64xf32>
    %22 = tpu.matmul %20, %21, %cst_9 {dimension_numbers = #tpu.dot_dimension_numbers<[1], [0], [0], [1], [0, 0, 1, 1], [], []>} : vector<2x8xf32>, vector<8x64xf32>, vector<2x64xf32> -> vector<2x64xf32>
    %23 = vector.extract_strided_slice %22 {offsets = [0, 0], sizes = [2, 32], strides = [1, 1]} : vector<2x64xf32> to vector<2x32xf32>
    %24 = vector.shape_cast %23 : vector<2x32xf32> to vector<2x1x32xf32>
    %25 = vector.extract_strided_slice %22 {offsets = [0, 32], sizes = [2, 32], strides = [1, 1]} : vector<2x64xf32> to vector<2x32xf32>
    %26 = vector.shape_cast %25 : vector<2x32xf32> to vector<2x1x32xf32>
    %27 = vector.broadcast %24 : vector<2x1x32xf32> to vector<2x8x32xf32>
    %28 = arith.mulf %7, %27 : vector<2x8x32xf32>
    %cst_10 = arith.constant dense<0.000000e+00> : vector<2x8xf32>
    %29 = vector.multi_reduction <add>, %28, %cst_10 [2] : vector<2x8x32xf32> to vector<2x8xf32>
    %30 = vector.shape_cast %29 : vector<2x8xf32> to vector<2x8x1xf32>
    %cst_11 = arith.constant 0.176776692 : f32
    %31 = vector.broadcast %cst_11 : f32 to vector<2x8x1xf32>
    %32 = arith.mulf %30, %31 : vector<2x8x1xf32>
    %c0_12 = arith.constant 0 : index
    %c0_13 = arith.constant 0 : index
    %c0_14 = arith.constant 0 : index
    %33 = vector.load %arg2[%c0_12, %c0_13, %c0_14] : memref<2x8x1xf32, #tpu.memory_space<vmem>>, vector<2x8x1xf32>
    %cst_15 = arith.constant 1.000000e+00 : f32
    %34 = vector.broadcast %cst_15 : f32 to vector<2x8x1xf32>
    %35 = arith.subf %33, %34 : vector<2x8x1xf32>
    %cst_16 = arith.constant 1.000000e+30 : f32
    %36 = vector.broadcast %cst_16 : f32 to vector<2x8x1xf32>
    %37 = arith.mulf %35, %36 : vector<2x8x1xf32>
    %38 = arith.addf %32, %37 : vector<2x8x1xf32>
    %cst_17 = arith.constant dense<0xFF800000> : vector<2x1xf32>
    %39 = vector.multi_reduction <maximumf>, %38, %cst_17 [1] : vector<2x8x1xf32> to vector<2x1xf32>
    %40 = vector.shape_cast %39 : vector<2x1xf32> to vector<2x1x1xf32>
    %41 = vector.broadcast %40 : vector<2x1x1xf32> to vector<2x8x1xf32>
    %42 = arith.subf %38, %41 : vector<2x8x1xf32>
    %43 = math.exp %42 : vector<2x8x1xf32>
    %cst_18 = arith.constant dense<0.000000e+00> : vector<2x1xf32>
    %44 = vector.multi_reduction <add>, %43, %cst_18 [1] : vector<2x8x1xf32> to vector<2x1xf32>
    %45 = vector.shape_cast %44 : vector<2x1xf32> to vector<2x1x1xf32>
    %46 = tpu.reciprocal %45 {approx = true} : vector<2x1x1xf32> -> vector<2x1x1xf32>
    %47 = vector.broadcast %46 : vector<2x1x1xf32> to vector<2x8x1xf32>
    %48 = arith.mulf %43, %47 : vector<2x8x1xf32>
    %49 = vector.broadcast %48 : vector<2x8x1xf32> to vector<2x8x32xf32>
    %50 = vector.broadcast %26 : vector<2x1x32xf32> to vector<2x8x32xf32>
    %51 = arith.mulf %49, %50 : vector<2x8x32xf32>
    %52 = arith.addf %9, %51 : vector<2x8x32xf32>
    %cst_19 = arith.constant 0.000000e+00 : f32
    %53 = vector.broadcast %cst_19 : f32 to vector<2x8x32xf32>
    %54 = arith.maximumf %52, %53 : vector<2x8x32xf32>
    %55 = vector.shape_cast %54 : vector<2x8x32xf32> to vector<16x32xf32>
    %c40 = arith.constant 40 : index
    %c0_20 = arith.constant 0 : index
    %56 = vector.load %arg3[%c40, %c0_20] : memref<80x64xf32, #tpu.memory_space<vmem>>, vector<32x16xf32>
    %cst_21 = arith.constant dense<0.000000e+00> : vector<16x16xf32>
    %57 = tpu.matmul %55, %56, %cst_21 {dimension_numbers = #tpu.dot_dimension_numbers<[1], [0], [0], [1], [0, 0, 1, 1], [], []>} : vector<16x32xf32>, vector<32x16xf32>, vector<16x16xf32> -> vector<16x16xf32>
    %c73 = arith.constant 73 : index
    %c0_22 = arith.constant 0 : index
    %58 = vector.load %arg3[%c73, %c0_22] : memref<80x64xf32, #tpu.memory_space<vmem>>, vector<1x16xf32>
    %59 = vector.broadcast %58 : vector<1x16xf32> to vector<16x16xf32>
    %60 = arith.addf %57, %59 : vector<16x16xf32>
    %c0_23 = arith.constant 0 : index
    %c0_24 = arith.constant 0 : index
    %61 = vector.load %arg4[%c0_23, %c0_24] : memref<16x16xf32, #tpu.memory_space<vmem>>, vector<16x16xf32>
    tpu.vector_store %arg4[%c0_23, %c0_24], %60 {strides = array<i32>} : memref<16x16xf32, #tpu.memory_space<vmem>>, vector<16x16xf32>,
    return
  }
}

</mosaic_0001>

<bundles_post_ra>
// kernel: slot_classifier.1
= control target key start
LH: loop header
LB: loop body
LE: loop exit
PB: predicated region body
PF: predicated region fallthrough
CT: control target
= control target key end

     0   :  { %vm112_vm0 = vcmask 58368   ;;  %s622_s0 = inlined_call_operand.vmem [shape: f32[16,32], index: 0, kind: input, shape index: {}]   ;;  %s623_s1 = inlined_call_operand.vmem [shape: f32[2,8], index: 1, kind: input, shape index: {}]   ;;  %s624_s2 = inlined_call_operand.vmem [shape: f32[2,8,1], index: 2, kind: input, shape index: {}]   ;;  %s625_s3 = inlined_call_operand.vmem [shape: f32[80,64], index: 3, kind: input, shape index: {}]   ;;  %s626_s4 = inlined_call_operand.hbm [shape: f32[16,16], index: 4, kind: output, shape index: {}]  }
   0x1   :  { %v111_v0 = vld [vmem:[%s623_s1] sm:$0x3] }
   0x2   :  { %9 = vsyncpa [#allocation3], 0  ;;  %v113_v1 = vsel %vm112_vm0, %v111_v0, -inf  ;;  %v23_v7 = vld [vmem:[%s625_s3 + $0x18] sm:$0xff]  ;;  %v22_v8 = vld [vmem:[%s625_s3 + $0x10] sm:$0xff]  ;;  %vm29_vm1 = vcmask 261120   ;;  %v203_v20 = vlaneseq }
   0x3   :  { %114 = vmax.xlane.f32.xlu0 %v113_v1  ;;  %441 = vmatprep.subr.mxu0 %v23_v7  ;;  %v512_v9 = vmov 0.0   ;;  %v18_v10 = vld [vmem:[%s622_s0] sm:$0xff]  ;;  %v21_v12 = vld [vmem:[%s625_s3 + $0x8] sm:$0xff]  ;;  %vm513_vm2 = vmmov 0   ;;  %vm125_vm3 = vcmask 64512   ;;  %v515_v42 = vmov 0  }
   0x4   :  { %452 = vmatprep.subr.mxu1 %v512_v9  ;;  %v124_v11 = vld [vmem:[%s625_s3 + $0x20] sm:$0xff]  ;;  %442 = vmatpush3.msra.mxu0 %v23_v7  ;;  %v19_v14 = vld [vmem:[%s622_s0 + $0x8] sm:$0xff]  ;;  %v514_v18 = vmov 1966171168   ;;  %v204_v22 = vshrl.u32 %v203_v20, 7  ;;  %vm250_vm4 = vcmask 7168  }
   0x5   :  { %449 = vmatprep.mubr.msk.f32.mxu0 %vm29_vm1, %v18_v10  ;;  %443 = vmatprep.subr.mxu0 %v22_v8  ;;  %v20_v13 = vld [vmem:[%s625_s3] sm:$0xff]  ;;  %v201_v19 = vunpack.c.l.s4 %v514_v18  ;;  %v418_v28 = vld [vmem:[%s625_s3 + $0x48] ss:$0 sm:$0xff]  ;;  %s516_s16 = smov 96   ;;  %s517_s19 = smov [#allocation2]   ;;  %vm399_vm5 = vcmask 130048  }
   0x6   :  { %453 = vmatpush3.msra.mxu1 %v124_v11  ;;  %444 = vmatpush3.msra.mxu0 %v22_v8  ;;  %v224_v27 = vsub.s32 0, %v204_v22  ;;  %v242_v43 = vld [vmem:[%s624_s2] sm:$0xff]  ;;  %v243_v45 = vld [vmem:[%s624_s2 + $0x8] sm:$0xff]  ;;  %s407_s20 = sshll.u32 %s517_s19, 4  ;;  %s408_s20 = int_to_ptr.vmem [resolvable:$true] %s407_s20 }
   0x7   :  { %454 = vmatprep.mubr.msk.f32.mxu1 %vm513_vm2, %v512_v9  ;;  %445 = vmatprep.subr.mxu0 %v21_v12  ;;  %v202_v21 = vunpack.c.0.s8 %v201_v19  ;;  %v422_v44 = vadd.f32 -1.0, %v242_v43  ;;  %v423_v47 = vadd.f32 -1.0, %v243_v45  ;;  %s490_s1 = scalar_lea.vmem %s408_s20, 256  ;;  %p495_p1 = scmp.lt.s32.totalorder %s408_s20, %s408_s20 }
   0x8   :  { %446 = vmatpush3.msra.mxu0 %v21_v12  ;;  %476 = vset.pattern.permute.xlu0 %v515_v42  ;;  %p491_p0 = scmp.ne.s32.totalorder %s408_s20, %s490_s1  ;;  %p496_p2 = scmp.lt.s32.totalorder %s490_s1, %s490_s1 }
   0x9   :  { %447 = vmatprep.subr.mxu0 %v20_v13  ;;  %v205_v23 = vsub.s32 %v202_v21, %v204_v22  ;;  %477 = vset.pattern.permute.xlu1 %v515_v42  ;;  %v246_v46 = vmul.f32 1e+30, %v422_v44  ;;  %v247_v51 = vmul.f32 1e+30, %v423_v47 }
   0xa   :  { %448 = vmatpush3.msra.mxu0 %v20_v13  ;;  %p497_p3 = por %p496_p2, %p495_p1 }
   0xb   :  { %450 = vmatmul.mubr.msk.f32.vlgmr.msra.gmra.mxu0 %vm29_vm1, %v19_v14 }
   0xc   :  { %p498_p4 = pnand %p497_p3, %p491_p0 }
  0x8c   :  { %v115_v2 = vpop.xlane.xlu0 %114 }
  0x8d   :  { %v116_v3 = vsub.f32 %v111_v0, %v115_v2 }
  0x8f   :  { %v117_v4 = vmul.f32 1.442695, %v116_v3 }
  0x91   :  { %478 = vpow2.f32 %v117_v4 }
  0x9e   :  { %v479_v5 = vpop.eup %478 }
  0x9f   :  { %v119_v6 = vsel %vm112_vm0, %v479_v5, 0.0 }
  0xa0   :  { %120 = vadd.xlane.f32.xlu0 %v119_v6 }
  0xcb   :  { %v451_v24 = vpop.f32.mrf.mxu0 }
  0xcc   :  { %v578_v36 = vadd.f32 %v451_v24, %v418_v28 }
  0xcd   :  { %v102_v29 = vpop.f32.mrf.mxu0 }
  0xce   :  { %v574_v34 = vadd.f32 %v418_v28, %v102_v29  ;;  %v308_v29 = vld [vmem:[%s625_s3 + $0x40] sm:$0xff] }
  0xcf   :  { %457 = vmatprep.subr.mxu1 %v308_v29 }
 0x129   :  { %v121_v15 = vpop.xlane.xlu0 %120 }
 0x12a   :  { %480 = vrcp.f32 %v121_v15 }
 0x137   :  { %v481_v16 = vpop.eup %480 }
 0x138   :  { %v123_v17 = vmul.f32 %v481_v16, %v479_v5 }
 0x13a   :  { %455 = vmatmul.mubr.msk.f32.vlgmr.msra.gmra.mxu1 %vm125_vm3, %v123_v17 }
 0x13b   :  { %458 = vmatpush3.msra.mxu1 %v308_v29 }
 0x1fa   :  { %v195_v25 = vpop.f32.mrf.mxu1 }
 0x1fb   :  { %v206_v26 = vrot.slane %v195_v25, %v205_v23 }
 0x1fc   :  { %v456_v30 = vpop.f32.mrf.mxu1 }
 0x1fd   :  { %v207_v31 = vcombine.high %v206_v26, %v206_v26  ;;  %v214_v32 = vrot.slane %v206_v26, %v205_v23  ;;  %v307_v30 = vld [vmem:[%s625_s3 + $0x38] sm:$0xff] }
 0x1fe   :  { %459 = vmatprep.subr.mxu1 %v307_v30 }
 0x1ff   :  { %v221_v33 = vrot.slane %v207_v31, %v205_v23  ;;  %v576_v35 = vrot.slane %v214_v32, %v224_v27  ;;  %460 = vmatpush3.msra.mxu1 %v307_v30  ;;  %v306_v31 = vld [vmem:[%s625_s3 + $0x30] sm:$0xff]  ;;  %v305_v32 = vld [vmem:[%s625_s3 + $0x28] sm:$0xff] }
 0x200   :  { %461 = vmatprep.subr.mxu1 %v306_v31 }
 0x201   :  { %v232_v37 = vmul.f32 %v576_v35, %v574_v34  ;;  %v582_v38 = vrot.slane %v221_v33, %v224_v27  ;;  %462 = vmatpush3.msra.mxu1 %v306_v31 }
 0x202   :  { %463 = vmatprep.subr.mxu1 %v305_v32 }
 0x203   :  { %v234_v39 = vsel %vm29_vm1, %v232_v37, 0.0  ;;  %v233_v40 = vmul.f32 %v582_v38, %v578_v36  ;;  %464 = vmatpush3.msra.mxu1 %v305_v32 }
 0x204   :  { %235 = vadd.xlane.f32.xlu1 %v234_v39 }
 0x205   :  { %v237_v41 = vsel %vm29_vm1, %v233_v40, 0.0 }
 0x208   :  { %238 = vadd.xlane.f32.xlu1 %v237_v41 }
 0x28d   :  { %v236_v48 = vpop.xlane.xlu1 %235 }
 0x28e   :  { %v240_v49 = vmul.f32 0.17677669, %v236_v48 }
 0x290   :  { %v248_v50 = vadd.f32 %v246_v46, %v240_v49 }
 0x291   :  { %v239_v52 = vpop.xlane.xlu1 %238 }
 0x292   :  { %v251_v53 = vsel %vm250_vm4, %v248_v50, -inf  ;;  %v241_v54 = vmul.f32 0.17677669, %v239_v52 }
 0x293   :  { %v252_v55 = vrot.slane %v251_v53, 4 }
 0x294   :  { %v249_v56 = vadd.f32 %v247_v51, %v241_v54 }
 0x295   :  { %v253_v57 = vmax.f32 %v251_v53, %v252_v55 }
 0x296   :  { %v258_v58 = vsel %vm250_vm4, %v249_v56, -inf }
 0x297   :  { %v254_v59 = vrot.slane %v253_v57, 2  ;;  %v259_v60 = vrot.slane %v258_v58, 4 }
 0x299   :  { %v255_v61 = vmax.f32 %v253_v57, %v254_v59  ;;  %v260_v62 = vmax.f32 %v258_v58, %v259_v60 }
 0x29b   :  { %v256_v63 = vrot.slane %v255_v61, 1  ;;  %v261_v0 = vrot.slane %v260_v62, 2 }
 0x29d   :  { %v257_v1 = vmax.f32 %v255_v61, %v256_v63  ;;  %v262_v2 = vmax.f32 %v260_v62, %v261_v0 }
 0x29f   :  { %v265_v3 = vsub.f32 %v248_v50, %v257_v1  ;;  %v263_v4 = vrot.slane %v262_v2, 1 }
 0x2a1   :  { %v267_v5 = vmul.f32 1.442695, %v265_v3  ;;  %v264_v6 = vmax.f32 %v262_v2, %v263_v4 }
 0x2a3   :  { %482 = vpow2.f32 %v267_v5  ;;  %v266_v7 = vsub.f32 %v249_v56, %v264_v6 }
 0x2a5   :  { %v269_v8 = vmul.f32 1.442695, %v266_v7 }
 0x2a7   :  { %484 = vpow2.f32 %v269_v8 }
 0x2b0   :  { %v483_v9 = vpop.eup %482 }
 0x2b1   :  { %v271_v10 = vsel %vm250_vm4, %v483_v9, 0.0 }
 0x2b2   :  { %v272_v11 = vrot.slane %v271_v10, 4 }
 0x2b4   :  { %v485_v12 = vpop.eup %484  ;;  %v273_v13 = vadd.f32 %v272_v11, %v271_v10 }
 0x2b5   :  { %v278_v14 = vsel %vm250_vm4, %v485_v12, 0.0 }
 0x2b6   :  { %v274_v15 = vrot.slane %v273_v13, 2  ;;  %v279_v16 = vrot.slane %v278_v14, 4 }
 0x2b8   :  { %v275_v17 = vadd.f32 %v274_v15, %v273_v13  ;;  %v280_v18 = vadd.f32 %v279_v16, %v278_v14 }
 0x2ba   :  { %v276_v19 = vrot.slane %v275_v17, 1  ;;  %v281_v20 = vrot.slane %v280_v18, 2 }
 0x2bc   :  { %v277_v21 = vadd.f32 %v276_v19, %v275_v17  ;;  %v282_v22 = vadd.f32 %v281_v20, %v280_v18 }
 0x2be   :  { %486 = vrcp.f32 %v277_v21  ;;  %v283_v23 = vrot.slane %v282_v22, 1 }
 0x2c0   :  { %v284_v24 = vadd.f32 %v283_v23, %v282_v22 }
 0x2c2   :  { %488 = vrcp.f32 %v284_v24 }
 0x2cb   :  { %v487_v25 = vpop.eup %486 }
 0x2cc   :  { %v287_v26 = vmul.f32 %v487_v25, %v483_v9 }
 0x2ce   :  { %291 = vperm.xlu0 %476, %v287_v26  }
 0x2cf   :  { %v489_v27 = vpop.eup %488 }
 0x2d0   :  { %v288_v28 = vmul.f32 %v489_v27, %v485_v12 }
 0x2d2   :  { %296 = vperm.xlu1 %477, %v288_v28  }
 0x349   :  { %v292_v33 = vpop.permute.xlu0 %291 }
 0x34a   :  { %v299_v37 = vmul.f32 %v292_v33, %v576_v35 }
 0x34c   :  { %v301_v39 = vadd.f32 %v299_v37, %v574_v34  ;;  %v424_v34 = vld [vmem:[%s625_s3 + $0x49] ss:$0 sm:$0xff] }
 0x34d   :  { %v297_v40 = vpop.permute.xlu1 %296 }
 0x34e   :  { %v303_v41 = vmax.f32 %v301_v39, 0.0  ;;  %v300_v42 = vmul.f32 %v297_v40, %v582_v38 }
 0x350   :  { %v302_v43 = vadd.f32 %v300_v42, %v578_v36  ;;  %316 = vrot.lane.b32.xlu1 %v303_v41, %s516_s16 }
 0x352   :  { %v304_v44 = vmax.f32 %v302_v43, 0.0 }
 0x354   :  { %318 = vrot.lane.b32.xlu1 %v304_v44, %s516_s16 }
 0x3c2   :  { %v317_v45 = vpop.permute.xlu1 %316 }
 0x3c3   :  { %465 = vmatprep.mubr.msk.f32.mxu1 %vm29_vm1, %v317_v45 }
 0x3c6   :  { %v319_v46 = vpop.permute.xlu1 %318 }
 0x3c7   :  { %466 = vmatmul.mubr.msk.f32.vlgmr.msra.gmra.mxu1 %vm29_vm1, %v319_v46 }
 0x487   :  { %v467_v35 = vpop.f32.mrf.mxu1 }
 0x488   :  { %v396_v38 = vadd.f32 %v467_v35, %v424_v34 }
 0x489   :  { %v390_v36 = vpop.f32.mrf.mxu1 }
 0x48a   :  { %401 = vst.msk [vmem:[#allocation2 + $0x8] sm:$0xff] %vm399_vm5, %v396_v38  ;;  %v391_v47 = vadd.f32 %v424_v34, %v390_v36 }
 0x48c   :  { %400 = vst.msk [vmem:[#allocation2] sm:$0xff] %vm399_vm5, %v391_v47 }
 0x48d   :  { %501 = shalt.err (!%p498_p4)
}
 0x48e   :  { %s518_s21 = smov 128   ;;  %s519_s22 = smov 8  }
 0x48f   :  { %413 = dma.vmem_to_hbm [thread:$0]  %s408_s20, 256, %s626_s4, [#allocation3], %s518_s21, %s518_s21, %s519_s22  }
 0x490   :  { %510 = dma.done.wait [#allocation3], 256  }
 0x491   :  { %511 = vsyncadd [#allocation3], 4294967040 }
 0x492   :  { %417 = vsyncpa [#allocation3], 1 }

</bundles_post_ra>
